<compile_context>
chip_gen: v7x
topology: tpu7x:2x2x1
jax: 0.10.0
libtpu: 0.0.40
codegen_flags: <defaults>
</compile_context>

<pallas_src>
import math

import jax
import jax.numpy as jnp
from jax.experimental import pallas as pl
from jax.experimental.pallas import tpu as pltpu

_VMEM_LIMIT_BYTES = 48 * 1024 * 1024  # headroom below v7x's 64 MiB physical VMEM


def _round_up(x, m):
    return ((x + m - 1) // m) * m


# --------------------------------------------------------------------------
# Kernel bodies
# --------------------------------------------------------------------------
def _support_kernel(x_ref, w_ref, o_ref):
    # s = x @ W  (one row tile per grid step; W fully resident)
    o_ref[...] = jnp.dot(
        x_ref[...], w_ref[...], preferred_element_type=jnp.float32
    ).astype(o_ref.dtype)


def _aggregate_kernel(adj_ref, s_ref, b_ref, o_ref, acc_ref):
    # out = relu(adj @ s + b), K-reduction over adj column blocks.
    k = pl.program_id(1)

    @pl.when(k == 0)
    def _():
        acc_ref[...] = jnp.zeros_like(acc_ref)

    acc_ref[...] += jnp.dot(
        adj_ref[...], s_ref[...], preferred_element_type=jnp.float32
    )

    @pl.when(k == pl.num_programs(1) - 1)
    def _():
        o_ref[...] = jnp.maximum(acc_ref[...] + b_ref[...], 0.0).astype(o_ref.dtype)


def _aggregate_residual_kernel(adj_ref, s_ref, b_ref, res_ref, o_ref, acc_ref):
    # out = relu(adj @ s + b) + residual
    k = pl.program_id(1)

    @pl.when(k == 0)
    def _():
        acc_ref[...] = jnp.zeros_like(acc_ref)

    acc_ref[...] += jnp.dot(
        adj_ref[...], s_ref[...], preferred_element_type=jnp.float32
    )

    @pl.when(k == pl.num_programs(1) - 1)
    def _():
        out = jnp.maximum(acc_ref[...] + b_ref[...], 0.0) + res_ref[...]
        o_ref[...] = out.astype(o_ref.dtype)


# --------------------------------------------------------------------------
# pallas_call wrappers
# --------------------------------------------------------------------------
def _support_matmul(x, w, *, tm, out_dtype):
    """s = x @ w, row-tiled. x: (Np, Fp), w: (Fp, Hp)."""
    Np, Fp = x.shape
    Hp = w.shape[1]
    gm = Np // tm
    return pl.pallas_call(
        _support_kernel,
        out_shape=jax.ShapeDtypeStruct((Np, Hp), out_dtype),
        grid_spec=pltpu.PrefetchScalarGridSpec(
            num_scalar_prefetch=0,
            grid=(gm,),
            in_specs=[
                pl.BlockSpec((tm, Fp), lambda i: (i, 0)),   # x row tile (streams)
                pl.BlockSpec((Fp, Hp), lambda i: (0, 0)),   # W resident
            ],
            out_specs=pl.BlockSpec((tm, Hp), lambda i: (i, 0)),
        ),
        compiler_params=pltpu.CompilerParams(
            dimension_semantics=("parallel",),
            vmem_limit_bytes=_VMEM_LIMIT_BYTES,
        ),
        cost_estimate=pl.CostEstimate(
            flops=2 * Np * Fp * Hp,
            transcendentals=0,
            bytes_accessed=(Np * Fp + Fp * Hp + Np * Hp) * 4,
        ),
    )(x, w)


def _aggregate(adj, support, bias, residual, *, tm, tk, out_dtype):
    """relu(adj @ support + bias) [+ residual], tiled (row, K) reduction."""
    Np = adj.shape[0]
    Hp = support.shape[1]
    gm, gk = Np // tm, Np // tk

    in_specs = [
        pl.BlockSpec((tm, tk), lambda i, k: (i, k)),   # adj streams (only heavy DMA)
        pl.BlockSpec((tk, Hp), lambda i, k: (k, 0)),   # support column of blocks
        pl.BlockSpec((1, Hp), lambda i, k: (0, 0)),    # bias resident
    ]
    args = [adj, support, bias]
    if residual is not None:
        in_specs.append(pl.BlockSpec((tm, Hp), lambda i, k: (i, 0)))  # resident per row
        args.append(residual)
        kernel = _aggregate_residual_kernel
    else:
        kernel = _aggregate_kernel

    itemsize = jnp.dtype(adj.dtype).itemsize
    return pl.pallas_call(
        kernel,
        out_shape=jax.ShapeDtypeStruct((Np, Hp), out_dtype),
        grid_spec=pltpu.PrefetchScalarGridSpec(
            num_scalar_prefetch=0,
            grid=(gm, gk),
            in_specs=in_specs,
            out_specs=pl.BlockSpec((tm, Hp), lambda i, k: (i, 0)),
            scratch_shapes=[pltpu.VMEM((tm, Hp), jnp.float32)],
        ),
        compiler_params=pltpu.CompilerParams(
            dimension_semantics=("parallel", "arbitrary"),
            vmem_limit_bytes=_VMEM_LIMIT_BYTES,
        ),
        cost_estimate=pl.CostEstimate(
            flops=2 * Np * Np * Hp,
            transcendentals=0,
            bytes_accessed=Np * Np * itemsize + 3 * Np * Hp * 4,
        ),
    )(*args)


def gcn_forward(x, adj, w1, b1, w2, b2, *, adj_in_bf16=False):
    """2-layer GCN forward (eval mode). x:(N,F) adj:(N,N) w1:(F,H) w2:(H,H)."""
    N, F = x.shape
    H = w1.shape[1]
    assert F == H, "residual x2 + input requires nfeat == nhid"
    assert adj.shape == (N, N)
    assert w2.shape == (H, H)

    # Lane/MXU-friendly padded sizes and tiles.
    Np = _round_up(max(N, 256), 256)
    TM = 256
    TK = 512 if Np % 512 == 0 else 256
    Fp = _round_up(F, 128)
    Hp = _round_up(H, 128)

    f32 = jnp.float32
    xp = jnp.pad(x.astype(f32), ((0, Np - N), (0, Fp - F)))
    adjp = jnp.pad(adj.astype(f32), ((0, Np - N), (0, Np - N)))
    w1p = jnp.pad(w1.astype(f32), ((0, Fp - F), (0, Hp - H)))
    w2p = jnp.pad(w2.astype(f32), ((0, Hp - H), (0, Hp - H)))
    b1p = jnp.pad(b1.reshape(1, -1).astype(f32), ((0, 0), (0, Hp - H)))
    b2p = jnp.pad(b2.reshape(1, -1).astype(f32), ((0, 0), (0, Hp - H)))

    # Mixed-precision fast path: adjacency + intermediates in bf16 (f32 accum).
    mm_dtype = jnp.bfloat16 if adj_in_bf16 else f32
    adj_mm = adjp.astype(mm_dtype)

    # dropout(p, training=False) is the identity in eval mode.
    # TODO(synk): training-mode dropout (pltpu.prng_random_bits mask) not emitted.

    # Layer 1: h1 = relu(adj @ (x @ W1) + b1)
    s1 = _support_matmul(xp.astype(mm_dtype), w1p.astype(mm_dtype),
                         tm=TM, out_dtype=mm_dtype)
    h1 = _aggregate(adj_mm, s1, b1p, None, tm=TM, tk=TK, out_dtype=mm_dtype)

    # Layer 2 + residual: out = relu(adj @ (h1 @ W2) + b2) + x
    s2 = _support_matmul(h1, w2p.astype(mm_dtype), tm=TM, out_dtype=mm_dtype)
    out = _aggregate(adj_mm, s2, b2p, xp, tm=TM, tk=TK, out_dtype=x.dtype)

    return out[:N, :H]


def _xavier_normal(key, fan_in, fan_out, gain=1.0):
    std = gain * math.sqrt(2.0 / (fan_in + fan_out))
    return std * jax.random.normal(key, (fan_in, fan_out), dtype=jnp.float32)


if __name__ == "__main__":
    # Small deterministic example: 8 nodes, nfeat = nhid = 32.
    N, NFEAT, NHID = 8, 32, 32

    key = jax.random.PRNGKey(0)
    kx, kadj, kw1, kw2 = jax.random.split(key, 4)

    x = jax.random.normal(kx, (N, NFEAT), dtype=jnp.float32)

    # Symmetric row-normalized adjacency with self-loops (typical GCN preproc).
    a = jax.random.uniform(kadj, (N, N), dtype=jnp.float32)
    a = (a + a.T) * 0.5 + jnp.eye(N, dtype=jnp.float32)
    adj = a / jnp.sum(a, axis=1, keepdims=True)

    # Parameters: xavier_normal_ weights, zero biases (reset_parameters(xariv=True)).
    w1 = _xavier_normal(kw1, NFEAT, NHID)
    b1 = jnp.zeros((NHID,), dtype=jnp.float32)
    w2 = _xavier_normal(kw2, NHID, NHID)
    b2 = jnp.zeros((NHID,), dtype=jnp.float32)

    # f32 path (exact PyTorch semantics).
    out = jax.block_until_ready(gcn_forward(x, adj, w1, b1, w2, b2))

    # Pure-JAX reference check.
    h1 = jnp.maximum(adj @ (x @ w1) + b1[None, :], 0.0)
    h2 = jnp.maximum(adj @ (h1 @ w2) + b2[None, :], 0.0)
    ref = h2 + x
    assert out.shape == (N, NHID)
    assert jnp.allclose(out, ref, atol=1e-5, rtol=1e-5), float(
        jnp.max(jnp.abs(out - ref))
    )

    # bf16-adjacency mixed-precision path (f32 accumulation), looser tolerance.
    out_bf16 = jax.block_until_ready(
        gcn_forward(x, adj, w1, b1, w2, b2, adj_in_bf16=True)
    )
    assert jnp.allclose(out_bf16, ref, atol=1e-1, rtol=1e-1), float(
        jnp.max(jnp.abs(out_bf16 - ref))
    )

    print("KERNEL_OK")
</pallas_src>

<mosaic_0001>
module attributes {stable_mosaic.version = 11 : i64} {
  func.func @_support_kernel(%arg0: i32, %arg1: memref<256x128xf32, #tpu.memory_space<vmem>>, %arg2: memref<128x128xf32, #tpu.memory_space<vmem>>, %arg3: memref<256x128xf32, #tpu.memory_space<vmem>>) attributes {dimension_semantics = [#tpu.dimension_semantics<parallel>], iteration_bounds = array<i64: 1>, scalar_prefetch = 0 : i64, scratch_operands = 0 : i64, tpu.core_type = #tpu.core_type<tc>, window_params = [{transform_indices = @transform_0, window_bounds = array<i64: 256, 128>}, {pipeline_mode = #tpu.pipeline_mode<synchronous>, transform_indices = @transform_1, window_bounds = array<i64: 128, 128>}, {transform_indices = @transform_2, window_bounds = array<i64: 256, 128>}]} {
    %c0 = arith.constant 0 : index
    %c0_0 = arith.constant 0 : index
    %0 = vector.load %arg1[%c0, %c0_0] : memref<256x128xf32, #tpu.memory_space<vmem>>, vector<256x128xf32>
    %c0_1 = arith.constant 0 : index
    %c0_2 = arith.constant 0 : index
    %1 = vector.load %arg2[%c0_1, %c0_2] : memref<128x128xf32, #tpu.memory_space<vmem>>, vector<128x128xf32>
    %cst = arith.constant dense<0.000000e+00> : vector<256x128xf32>
    %2 = tpu.matmul %0, %1, %cst {dimension_numbers = #tpu.dot_dimension_numbers<[1], [0], [0], [1], [0, 0, 1, 1], [], []>} : vector<256x128xf32>, vector<128x128xf32>, vector<256x128xf32> -> vector<256x128xf32>
    %c0_3 = arith.constant 0 : index
    %c0_4 = arith.constant 0 : index
    %3 = vector.load %arg3[%c0_3, %c0_4] : memref<256x128xf32, #tpu.memory_space<vmem>>, vector<256x128xf32>
    tpu.vector_store %arg3[%c0_3, %c0_4], %2 {strides = array<i32>} : memref<256x128xf32, #tpu.memory_space<vmem>>, vector<256x128xf32>,
    return
  }
  func.func @transform_0(%arg0: i32) -> (i32, i32) {
    %c0_i32 = arith.constant 0 : i32
    %c0_i32_0 = arith.constant 0 : i32
    return %arg0, %c0_i32 : i32, i32
  }
  func.func @transform_1(%arg0: i32) -> (i32, i32) {
    %c0_i32 = arith.constant 0 : i32
    %c0_i32_0 = arith.constant 0 : i32
    %c0_i32_1 = arith.constant 0 : i32
    return %c0_i32, %c0_i32_0 : i32, i32
  }
  func.func @transform_2(%arg0: i32) -> (i32, i32) {
    %c0_i32 = arith.constant 0 : i32
    %c0_i32_0 = arith.constant 0 : i32
    return %arg0, %c0_i32 : i32, i32
  }
}

</mosaic_0001>

<bundles_post_ra>
// kernel: tpu_custom_call.1
= control target key start
LH: loop header
LB: loop body
LE: loop exit
PB: predicated region body
PF: predicated region fallthrough
CT: control target
= control target key end

     0   :  { %7 = vsyncpa [#allocation3], 0  ;;  %s681_s0 = inlined_call_operand.hbm [shape: f32[256,128], index: 0, kind: input, shape index: {}]   ;;  %s682_s1 = inlined_call_operand.hbm [shape: f32[128,128], index: 1, kind: input, shape index: {}]   ;;  %s683_s2 = inlined_call_operand.hbm [shape: f32[256,128], index: 2, kind: output, shape index: {}]  }
   0x1   :  { %8 = vsyncpa [#allocation6], 0 }
   0x2   :  { %9 = vsyncpa [#allocation4], 0  ;;  %s616_s9 = smov [#allocation2]   ;;  %s544_s13 = scalar_lea.hbm %s681_s0, 4096 }
   0x3   :  { %s15_s10 = sshll.u32 %s616_s9, 4  ;;  %p545_p0 = scmp.ne.s32.totalorder %s681_s0, %s544_s13  ;;  %s16_s10 = int_to_ptr.vmem [resolvable:$true] %s15_s10 }
   0x4   :  { %p548_p1 = scmp.lt.u32.totalorder %s544_s13, %s681_s0 }
   0x6   :  { %p550_p2 = pnand %p548_p1, %p545_p0 }
   0x8   :  { %553 = shalt.err (!%p550_p2)
}
   0x9   :  { %s554_s18 = scalar_lea.vmem %s16_s10, 4096  ;;  %p559_p4 = scmp.lt.s32.totalorder %s16_s10, %s16_s10 }
   0xa   :  { %p555_p3 = scmp.ne.s32.totalorder %s16_s10, %s554_s18  ;;  %p560_p5 = scmp.lt.s32.totalorder %s554_s18, %s554_s18 }
   0xc   :  { %p561_p6 = por %p560_p5, %p559_p4 }
   0xe   :  { %p562_p7 = pnand %p561_p6, %p555_p3 }
  0x10   :  { %565 = shalt.err (!%p562_p7)
}
  0x11   :  { %s617_s19 = smov 128   ;;  %s618_s20 = smov 8  }
  0x12   :  { %21 = dma.hbm_to_vmem [thread:$0]  %s681_s0, 4096, %s16_s10, [#allocation3], %s617_s19, %s617_s19, %s618_s20  }
  0x13   :  { %s619_s23 = smov [#allocation5]   ;;  %s566_s27 = scalar_lea.hbm %s682_s1, 2048 }
  0x14   :  { %s27_s24 = sshll.u32 %s619_s23, 4  ;;  %p567_p8 = scmp.ne.s32.totalorder %s682_s1, %s566_s27  ;;  %s28_s24 = int_to_ptr.vmem [resolvable:$true] %s27_s24 }
  0x15   :  { %p570_p9 = scmp.lt.u32.totalorder %s566_s27, %s682_s1 }
  0x17   :  { %p572_p10 = pnand %p570_p9, %p567_p8 }
  0x19   :  { %575 = shalt.err (!%p572_p10)
}
  0x1a   :  { %s576_s4 = scalar_lea.vmem %s28_s24, 2048  ;;  %p581_p12 = scmp.lt.s32.totalorder %s28_s24, %s28_s24 }
  0x1b   :  { %p577_p11 = scmp.ne.s32.totalorder %s28_s24, %s576_s4  ;;  %p582_p13 = scmp.lt.s32.totalorder %s576_s4, %s576_s4 }
  0x1d   :  { %p583_p0 = por %p582_p13, %p581_p12 }
  0x1f   :  { %p584_p1 = pnand %p583_p0, %p577_p11 }
  0x21   :  { %587 = shalt.err (!%p584_p1)
}
  0x22   :  { %33 = dma.hbm_to_vmem [thread:$0]  %s682_s1, 2048, %s28_s24, [#allocation6], %s617_s19, %s617_s19, %s618_s20  }
  0x23   :  { %610 = dma.done.wait [#allocation3], 4096  }
  0x24   :  { %611 = vsyncadd [#allocation3], 4294963200 }
  0x25   :  { %612 = dma.done.wait [#allocation6], 2048  }
  0x26   :  { %613 = vsyncadd [#allocation6], 4294965248  ;;  %v72_v0 = vld [vmem:[#allocation5] sm:$0xff]  ;;  %v73_v1 = vld [vmem:[#allocation5 + $0x8] sm:$0xff]  ;;  %s620_s1 = smov [#allocation7]  }
  0x27   :  { %v74_v2 = vld [vmem:[#allocation5 + $0x10] sm:$0xff]  ;;  %v491_v3 = vpack.c.bf16 %v73_v1, %v72_v0  ;;  %v75_v4 = vld [vmem:[#allocation5 + $0x18] sm:$0xff]  ;;  %v76_v6 = vld [vmem:[#allocation5 + $0x20] sm:$0xff]  ;;  %s350_s6 = sshll.u32 %s620_s1, 4  ;;  %s351_s6 = int_to_ptr.vmem [resolvable:$true] %s350_s6 }
  0x28   :  { %v495_v5 = vpack.c.bf16 %v75_v4, %v74_v2  ;;  %v77_v7 = vld [vmem:[#allocation5 + $0x28] sm:$0xff]  ;;  %v40_v9 = vld [vmem:[#allocation2] sm:$0xff]  ;;  %v78_v11 = vld [vmem:[#allocation5 + $0x30] sm:$0xff]  ;;  %s588_s7 = scalar_lea.vmem %s351_s6, 4096  ;;  %p593_p3 = scmp.lt.s32.totalorder %s351_s6, %s351_s6 }
  0x29   :  { %492 = vmatprep.subr.bf16.mxu0 %v491_v3  ;;  %523 = vmatprep.subr.bf16.mxu1 %v491_v3  ;;  %v499_v8 = vpack.c.bf16 %v77_v7, %v76_v6  ;;  %v56_v10 = vld [vmem:[#allocation2 + $0x80] sm:$0xff]  ;;  %v79_v12 = vld [vmem:[#allocation5 + $0x38] sm:$0xff]  ;;  %v81_v15 = vld [vmem:[#allocation5 + $0x48] sm:$0xff]  ;;  %p589_p2 = scmp.ne.s32.totalorder %s351_s6, %s588_s7  ;;  %p594_p4 = scmp.lt.s32.totalorder %s588_s7, %s588_s7 }
  0x2a   :  { %494 = vmatpush3.bf16.msra.mxu0 %v491_v3  ;;  %531 = vmatpush3.bf16.msra.mxu1 %v491_v3  ;;  %v503_v13 = vpack.c.bf16 %v79_v12, %v78_v11  ;;  %v80_v14 = vld [vmem:[#allocation5 + $0x40] sm:$0xff]  ;;  %v82_v17 = vld [vmem:[#allocation5 + $0x50] sm:$0xff]  ;;  %v83_v18 = vld [vmem:[#allocation5 + $0x58] sm:$0xff] }
  0x2b   :  { %496 = vmatprep.subr.bf16.mxu0 %v495_v5  ;;  %524 = vmatprep.subr.bf16.mxu1 %v495_v5  ;;  %v507_v16 = vpack.c.bf16 %v81_v15, %v80_v14  ;;  %v511_v19 = vpack.c.bf16 %v83_v18, %v82_v17  ;;  %v84_v20 = vld [vmem:[#allocation5 + $0x60] sm:$0xff]  ;;  %v85_v21 = vld [vmem:[#allocation5 + $0x68] sm:$0xff]  ;;  %v86_v23 = vld [vmem:[#allocation5 + $0x70] sm:$0xff]  ;;  %p595_p5 = por %p594_p4, %p593_p3 }
  0x2c   :  { %443 = vmatprep.mubr.f32.mxu0 %v40_v9  ;;  %467 = vmatprep.mubr.f32.mxu1 %v56_v10  ;;  %v515_v22 = vpack.c.bf16 %v85_v21, %v84_v20  ;;  %v87_v24 = vld [vmem:[#allocation5 + $0x78] sm:$0xff]  ;;  %v41_v26 = vld [vmem:[#allocation2 + $0x8] sm:$0xff]  ;;  %v42_v28 = vld [vmem:[#allocation2 + $0x10] sm:$0xff] }
  0x2d   :  { %v519_v25 = vpack.c.bf16 %v87_v24, %v86_v23  ;;  %v57_v27 = vld [vmem:[#allocation2 + $0x88] sm:$0xff]  ;;  %v58_v29 = vld [vmem:[#allocation2 + $0x90] sm:$0xff]  ;;  %v43_v30 = vld [vmem:[#allocation2 + $0x18] sm:$0xff]  ;;  %p596_p6 = pnand %p595_p5, %p589_p2 }
  0x2e   :  { %498 = vmatpush3.bf16.msra.mxu0 %v495_v5  ;;  %532 = vmatpush3.bf16.msra.mxu1 %v495_v5  ;;  %v59_v31 = vld [vmem:[#allocation2 + $0x98] sm:$0xff]  ;;  %v44_v32 = vld [vmem:[#allocation2 + $0x20] sm:$0xff]  ;;  %v45_v34 = vld [vmem:[#allocation2 + $0x28] sm:$0xff] }
  0x2f   :  { %500 = vmatprep.subr.bf16.mxu0 %v499_v8  ;;  %525 = vmatprep.subr.bf16.mxu1 %v499_v8  ;;  %v60_v33 = vld [vmem:[#allocation2 + $0xa0] sm:$0xff]  ;;  %v61_v35 = vld [vmem:[#allocation2 + $0xa8] sm:$0xff]  ;;  %v46_v36 = vld [vmem:[#allocation2 + $0x30] sm:$0xff] }
  0x30   :  { %v62_v37 = vld [vmem:[#allocation2 + $0xb0] sm:$0xff]  ;;  %v47_v38 = vld [vmem:[#allocation2 + $0x38] sm:$0xff]  ;;  %v48_v40 = vld [vmem:[#allocation2 + $0x40] sm:$0xff] }
  0x31   :  { %v63_v39 = vld [vmem:[#allocation2 + $0xb8] sm:$0xff]  ;;  %v64_v41 = vld [vmem:[#allocation2 + $0xc0] sm:$0xff]  ;;  %v49_v42 = vld [vmem:[#allocation2 + $0x48] sm:$0xff] }
  0x32   :  { %502 = vmatpush3.bf16.msra.mxu0 %v499_v8  ;;  %533 = vmatpush3.bf16.msra.mxu1 %v499_v8  ;;  %v65_v43 = vld [vmem:[#allocation2 + $0xc8] sm:$0xff]  ;;  %v50_v44 = vld [vmem:[#allocation2 + $0x50] sm:$0xff]  ;;  %v51_v46 = vld [vmem:[#allocation2 + $0x58] sm:$0xff] }
  0x33   :  { %504 = vmatprep.subr.bf16.mxu0 %v503_v13  ;;  %526 = vmatprep.subr.bf16.mxu1 %v503_v13  ;;  %v66_v45 = vld [vmem:[#allocation2 + $0xd0] sm:$0xff]  ;;  %v67_v47 = vld [vmem:[#allocation2 + $0xd8] sm:$0xff]  ;;  %v52_v48 = vld [vmem:[#allocation2 + $0x60] sm:$0xff] }
  0x34   :  { %v68_v49 = vld [vmem:[#allocation2 + $0xe0] sm:$0xff]  ;;  %v53_v50 = vld [vmem:[#allocation2 + $0x68] sm:$0xff]  ;;  %v54_v52 = vld [vmem:[#allocation2 + $0x70] sm:$0xff] }
  0x35   :  { %v69_v51 = vld [vmem:[#allocation2 + $0xe8] sm:$0xff]  ;;  %v70_v53 = vld [vmem:[#allocation2 + $0xf0] sm:$0xff]  ;;  %v55_v54 = vld [vmem:[#allocation2 + $0x78] sm:$0xff] }
  0x36   :  { %506 = vmatpush3.bf16.msra.mxu0 %v503_v13  ;;  %534 = vmatpush3.bf16.msra.mxu1 %v503_v13  ;;  %v71_v55 = vld [vmem:[#allocation2 + $0xf8] sm:$0xff] }
  0x37   :  { %508 = vmatprep.subr.bf16.mxu0 %v507_v16  ;;  %527 = vmatprep.subr.bf16.mxu1 %v507_v16 }
  0x3a   :  { %510 = vmatpush3.bf16.msra.mxu0 %v507_v16  ;;  %535 = vmatpush3.bf16.msra.mxu1 %v507_v16 }
  0x3b   :  { %512 = vmatprep.subr.bf16.mxu0 %v511_v19  ;;  %528 = vmatprep.subr.bf16.mxu1 %v511_v19 }
  0x3e   :  { %514 = vmatpush3.bf16.msra.mxu0 %v511_v19  ;;  %536 = vmatpush3.bf16.msra.mxu1 %v511_v19 }
  0x3f   :  { %516 = vmatprep.subr.bf16.mxu0 %v515_v22  ;;  %529 = vmatprep.subr.bf16.mxu1 %v515_v22 }
  0x42   :  { %518 = vmatpush3.bf16.msra.mxu0 %v515_v22  ;;  %537 = vmatpush3.bf16.msra.mxu1 %v515_v22 }
  0x43   :  { %520 = vmatprep.subr.bf16.mxu0 %v519_v25  ;;  %530 = vmatprep.subr.bf16.mxu1 %v519_v25 }
  0x46   :  { %522 = vmatpush3.bf16.msra.mxu0 %v519_v25  ;;  %538 = vmatpush3.bf16.msra.mxu1 %v519_v25 }
  0x49   :  { %444 = vmatmul.mubr.f32.vlgmr.msra.gmra.mrb[0].mxu0 %v41_v26  ;;  %468 = vmatmul.mubr.f32.vlgmr.msra.gmra.mrb[0].mxu1 %v57_v27 }
  0x4a   :  { %446 = vmatprep.mubr.f32.mxu0 %v42_v28  ;;  %470 = vmatprep.mubr.f32.mxu1 %v58_v29 }
  0x4d   :  { %447 = vmatmul.mubr.f32.gmra.mrb[2].mxu0 %v43_v30  ;;  %471 = vmatmul.mubr.f32.gmra.mrb[2].mxu1 %v59_v31 }
  0x4e   :  { %449 = vmatprep.mubr.f32.mxu0 %v44_v32  ;;  %473 = vmatprep.mubr.f32.mxu1 %v60_v33 }
  0x51   :  { %450 = vmatmul.mubr.f32.gmra.mrb[4].mxu0 %v45_v34  ;;  %474 = vmatmul.mubr.f32.gmra.mrb[4].mxu1 %v61_v35 }
  0x52   :  { %452 = vmatprep.mubr.f32.mxu0 %v46_v36  ;;  %476 = vmatprep.mubr.f32.mxu1 %v62_v37 }
  0x55   :  { %453 = vmatmul.mubr.f32.gmra.mrb[6].mxu0 %v47_v38  ;;  %477 = vmatmul.mubr.f32.gmra.mrb[6].mxu1 %v63_v39 }
  0x56   :  { %455 = vmatprep.mubr.f32.mxu0 %v48_v40  ;;  %479 = vmatprep.mubr.f32.mxu1 %v64_v41 }
  0x59   :  { %456 = vmatmul.mubr.f32.gmra.mrb[8].mxu0 %v49_v42  ;;  %480 = vmatmul.mubr.f32.gmra.mrb[8].mxu1 %v65_v43 }
  0x5a   :  { %458 = vmatprep.mubr.f32.mxu0 %v50_v44  ;;  %482 = vmatprep.mubr.f32.mxu1 %v66_v45 }
  0x5d   :  { %459 = vmatmul.mubr.f32.gmra.mrb[10].mxu0 %v51_v46  ;;  %483 = vmatmul.mubr.f32.gmra.mrb[10].mxu1 %v67_v47 }
  0x5e   :  { %461 = vmatprep.mubr.f32.mxu0 %v52_v48  ;;  %485 = vmatprep.mubr.f32.mxu1 %v68_v49 }
  0x61   :  { %462 = vmatmul.mubr.f32.gmra.mrb[12].mxu0 %v53_v50  ;;  %486 = vmatmul.mubr.f32.gmra.mrb[12].mxu1 %v69_v51 }
  0x62   :  { %464 = vmatprep.mubr.f32.mxu0 %v54_v52  ;;  %488 = vmatprep.mubr.f32.mxu1 %v70_v53 }
  0x65   :  { %465 = vmatmul.mubr.f32.gmra.mrb[14].mxu0 %v55_v54  ;;  %489 = vmatmul.mubr.f32.gmra.mrb[14].mxu1 %v71_v55 }
 0x11c   :  { %v445_v56 = vpop.f32.mrb[0].mxu0  ;;  %v469_v57 = vpop.f32.mrb[0].mxu1 }
 0x11d   :  { %314 = vst [vmem:[#allocation7 + $0x8] sm:$0xff] %v445_v56  ;;  %330 = vst [vmem:[#allocation7 + $0x88] sm:$0xff] %v469_v57  ;;  %v154_v58 = vpop.f32.mrb[1].mxu0  ;;  %v234_v59 = vpop.f32.mrb[1].mxu1 }
 0x11e   :  { %313 = vst [vmem:[#allocation7] sm:$0xff] %v154_v58  ;;  %329 = vst [vmem:[#allocation7 + $0x80] sm:$0xff] %v234_v59 }
 0x120   :  { %v448_v60 = vpop.f32.mrb[2].mxu0  ;;  %v472_v61 = vpop.f32.mrb[2].mxu1 }
 0x121   :  { %316 = vst [vmem:[#allocation7 + $0x18] sm:$0xff] %v448_v60  ;;  %332 = vst [vmem:[#allocation7 + $0x98] sm:$0xff] %v472_v61  ;;  %v164_v62 = vpop.f32.mrb[3].mxu0  ;;  %v244_v63 = vpop.f32.mrb[3].mxu1 }
 0x122   :  { %315 = vst [vmem:[#allocation7 + $0x10] sm:$0xff] %v164_v62  ;;  %331 = vst [vmem:[#allocation7 + $0x90] sm:$0xff] %v244_v63 }
 0x124   :  { %v451_v0 = vpop.f32.mrb[4].mxu0  ;;  %v475_v1 = vpop.f32.mrb[4].mxu1 }
 0x125   :  { %318 = vst [vmem:[#allocation7 + $0x28] sm:$0xff] %v451_v0  ;;  %334 = vst [vmem:[#allocation7 + $0xa8] sm:$0xff] %v475_v1  ;;  %v174_v2 = vpop.f32.mrb[5].mxu0  ;;  %v254_v3 = vpop.f32.mrb[5].mxu1 }
 0x126   :  { %317 = vst [vmem:[#allocation7 + $0x20] sm:$0xff] %v174_v2  ;;  %333 = vst [vmem:[#allocation7 + $0xa0] sm:$0xff] %v254_v3 }
 0x128   :  { %v454_v4 = vpop.f32.mrb[6].mxu0  ;;  %v478_v5 = vpop.f32.mrb[6].mxu1 }
 0x129   :  { %320 = vst [vmem:[#allocation7 + $0x38] sm:$0xff] %v454_v4  ;;  %336 = vst [vmem:[#allocation7 + $0xb8] sm:$0xff] %v478_v5  ;;  %v184_v6 = vpop.f32.mrb[7].mxu0  ;;  %v264_v7 = vpop.f32.mrb[7].mxu1 }
 0x12a   :  { %319 = vst [vmem:[#allocation7 + $0x30] sm:$0xff] %v184_v6  ;;  %335 = vst [vmem:[#allocation7 + $0xb0] sm:$0xff] %v264_v7 }
 0x12c   :  { %v457_v8 = vpop.f32.mrb[8].mxu0  ;;  %v481_v9 = vpop.f32.mrb[8].mxu1 }
 0x12d   :  { %322 = vst [vmem:[#allocation7 + $0x48] sm:$0xff] %v457_v8  ;;  %338 = vst [vmem:[#allocation7 + $0xc8] sm:$0xff] %v481_v9  ;;  %v194_v10 = vpop.f32.mrb[9].mxu0  ;;  %v274_v11 = vpop.f32.mrb[9].mxu1 }
 0x12e   :  { %321 = vst [vmem:[#allocation7 + $0x40] sm:$0xff] %v194_v10  ;;  %337 = vst [vmem:[#allocation7 + $0xc0] sm:$0xff] %v274_v11 }
 0x130   :  { %v460_v12 = vpop.f32.mrb[10].mxu0  ;;  %v484_v13 = vpop.f32.mrb[10].mxu1 }
 0x131   :  { %324 = vst [vmem:[#allocation7 + $0x58] sm:$0xff] %v460_v12  ;;  %340 = vst [vmem:[#allocation7 + $0xd8] sm:$0xff] %v484_v13  ;;  %v204_v14 = vpop.f32.mrb[11].mxu0  ;;  %v284_v15 = vpop.f32.mrb[11].mxu1 }
 0x132   :  { %323 = vst [vmem:[#allocation7 + $0x50] sm:$0xff] %v204_v14  ;;  %339 = vst [vmem:[#allocation7 + $0xd0] sm:$0xff] %v284_v15 }
 0x134   :  { %v463_v16 = vpop.f32.mrb[12].mxu0  ;;  %v487_v17 = vpop.f32.mrb[12].mxu1 }
 0x135   :  { %326 = vst [vmem:[#allocation7 + $0x68] sm:$0xff] %v463_v16  ;;  %342 = vst [vmem:[#allocation7 + $0xe8] sm:$0xff] %v487_v17  ;;  %v214_v18 = vpop.f32.mrb[13].mxu0  ;;  %v294_v19 = vpop.f32.mrb[13].mxu1 }
 0x136   :  { %325 = vst [vmem:[#allocation7 + $0x60] sm:$0xff] %v214_v18  ;;  %341 = vst [vmem:[#allocation7 + $0xe0] sm:$0xff] %v294_v19 }
 0x138   :  { %v466_v20 = vpop.f32.mrb[14].mxu0  ;;  %v490_v21 = vpop.f32.mrb[14].mxu1 }
 0x139   :  { %328 = vst [vmem:[#allocation7 + $0x78] sm:$0xff] %v466_v20  ;;  %344 = vst [vmem:[#allocation7 + $0xf8] sm:$0xff] %v490_v21  ;;  %v224_v22 = vpop.f32.mrb[15].mxu0  ;;  %v304_v23 = vpop.f32.mrb[15].mxu1 }
 0x13a   :  { %327 = vst [vmem:[#allocation7 + $0x70] sm:$0xff] %v224_v22  ;;  %343 = vst [vmem:[#allocation7 + $0xf0] sm:$0xff] %v304_v23 }
 0x13b   :  { %599 = shalt.err (!%p596_p6)
}
 0x13c   :  { %s600_s10 = scalar_lea.hbm %s683_s2, 4096 }
 0x13d   :  { %p601_p7 = scmp.ne.s32.totalorder %s683_s2, %s600_s10  ;;  %p604_p8 = scmp.lt.u32.totalorder %s600_s10, %s683_s2 }
 0x13f   :  { %p606_p9 = pnand %p604_p8, %p601_p7 }
 0x141   :  { %609 = shalt.err (!%p606_p9)
}
 0x142   :  { %356 = dma.vmem_to_hbm [thread:$0]  %s351_s6, 4096, %s683_s2, [#allocation4], %s617_s19, %s617_s19, %s618_s20  }
 0x143   :  { %614 = dma.done.wait [#allocation4], 4096  }
 0x144   :  { %615 = vsyncadd [#allocation4], 4294963200 }
 0x145   :  { %360 = vsyncpa [#allocation3], 1 }
 0x146   :  { %361 = vsyncpa [#allocation6], 1 }
 0x147   :  { %362 = vsyncpa [#allocation4], 1 }

</bundles_post_ra>
